<compile_context>
chip_gen: v6e
topology: v6e:2x2x1
jax: 0.10.0
libtpu: 0.0.40
codegen_flags: <defaults>
</compile_context>

<pallas_src>
import math

import jax
import jax.numpy as jnp
import numpy as np
from jax.experimental import pallas as pl
from jax.experimental.pallas import tpu as pltpu


_LANE_CANDIDATES = (512, 384, 256, 128)  # multiples of 128 -> unmasked full-lane stores
_MAX_BLOCK_ROWS = 1024                   # 1024 x 512 x 4B = 2 MiB per f32 block
_TARGET_STEPS = 8                        # aim for >= ~8 grid steps (pipelining / 2 TCs)


def _round_up(x, m):
    return ((x + m - 1) // m) * m


def _faceswap_quant_kernel(img_ref, out_ref):
    # 8-bit quantization round trip, in the module's evaluation order:
    #   clamp(-1,1) -> (x+1)/2*255 + 0.5 -> clamp(0,255) -> uint8 truncation
    #   -> ToTensor (/255) -> Normalize((v-0.5)/0.5)
    x = img_ref[...].astype(jnp.float32)                       # in-kernel cast (free, VPU)
    xc = jnp.clip(x, -1.0, 1.0)
    q = jnp.floor(jnp.clip((xc + 1.0) * 0.5 * 255.0 + 0.5, 0.0, 255.0))
    out_ref[...] = ((q / 255.0 - 0.5) / 0.5).astype(out_ref.dtype)


def faceswap_forward(image, cover_image=None, out_dtype=None, donate_input=False):
    """Mirrors FaceSwap.forward((image, cover_image)) -> noised_image.

    `cover_image` is accepted (as in the PyTorch signature) but unused by the
    forward computation (matches the module).  Only the quantization round
    trip is modeled; see TODO above for the external face-swap step.
    """
    del cover_image  # unused, matches the PyTorch module

    if out_dtype is None:
        out_dtype = image.dtype

    orig_shape = image.shape
    total = math.prod(int(d) for d in orig_shape)

    # Pick a lane width (multiple of 128) that divides the element count so
    # no padding pass is needed.  NCHW -> flat reshape is a free bitcast.
    lane = None
    for cand in _LANE_CANDIDATES:
        if total % cand == 0:
            lane = cand
            break

    x = image.reshape(-1)  # native dtype, no wrapper-side cast
    pad = 0
    if lane is None:
        # Rare fallback for awkward element counts: one pad + one slice pass.
        lane = 128
        pad = _round_up(total, lane) - total
        x = jnp.pad(x, (0, pad))

    rows = (total + pad) // lane
    x2 = x.reshape(rows, lane)

    if rows <= 8:
        block_rows = rows  # full row extent: (8,128) rule satisfied by equality
    else:
        block_rows = min(_MAX_BLOCK_ROWS,
                         _round_up(pl.cdiv(rows, _TARGET_STEPS), 8))
    grid = (pl.cdiv(rows, block_rows),)  # ragged last block is masked by Pallas

    call_kwargs = {}
    if donate_input and np.dtype(out_dtype) == np.dtype(image.dtype):
        call_kwargs["input_output_aliases"] = {0: 0}

    out2 = pl.pallas_call(
        _faceswap_quant_kernel,
        out_shape=jax.ShapeDtypeStruct((rows, lane), out_dtype),
        grid_spec=pltpu.PrefetchScalarGridSpec(
            num_scalar_prefetch=0,
            grid=grid,
            in_specs=[pl.BlockSpec((block_rows, lane), lambda r: (r, 0))],
            out_specs=pl.BlockSpec((block_rows, lane), lambda r: (r, 0)),
        ),
        compiler_params=pltpu.CompilerParams(
            dimension_semantics=("parallel",),
        ),
        **call_kwargs,
    )(x2)

    out = out2.reshape(-1)
    if pad:
        out = out[:total]
    return out.reshape(orig_shape)


if __name__ == "__main__":
    key = jax.random.PRNGKey(0)
    k1, k2, k3 = jax.random.split(key, 3)

    def ref_roundtrip(img):
        xr = jnp.clip(img.astype(jnp.float32), -1.0, 1.0)
        q = jnp.floor(jnp.clip((xr + 1.0) * 0.5 * 255.0 + 0.5, 0.0, 255.0))
        return (q / 255.0 - 0.5) / 0.5

    # Case 1: module-like small images (batch=2, 3 RGB channels, 16x16).
    B, C, H, W = 2, 3, 16, 16
    image = jax.random.uniform(k1, (B, C, H, W), jnp.float32, -1.5, 1.5)
    cover_image = jax.random.uniform(k2, (B, C, H, W), jnp.float32, -1.0, 1.0)
    noised = jax.block_until_ready(faceswap_forward(image, cover_image))
    assert noised.shape == image.shape and noised.dtype == image.dtype
    assert float(jnp.max(jnp.abs(noised - ref_roundtrip(image)))) < 1e-6

    # Case 2: multi-step pipelined grid (several row blocks).
    img2 = jax.random.uniform(k3, (2, 3, 64, 64), jnp.float32, -1.2, 1.2)
    out2 = jax.block_until_ready(faceswap_forward(img2))
    assert float(jnp.max(jnp.abs(out2 - ref_roundtrip(img2)))) < 1e-6

    # Case 3: ragged last row block (rows not a multiple of block_rows).
    img3 = jax.random.uniform(k1, (2, 3, 20, 32), jnp.float32, -1.2, 1.2)
    out3 = jax.block_until_ready(faceswap_forward(img3))
    assert float(jnp.max(jnp.abs(out3 - ref_roundtrip(img3)))) < 1e-6

    # Case 4: awkward element count -> padded fallback path.
    img4 = jax.random.uniform(k2, (1, 3, 7, 9), jnp.float32, -1.2, 1.2)
    out4 = jax.block_until_ready(faceswap_forward(img4))
    assert float(jnp.max(jnp.abs(out4 - ref_roundtrip(img4)))) < 1e-6

    # Case 5: bf16 stays narrow end-to-end (in-kernel cast, bf16 output).
    img5 = jax.random.uniform(k3, (2, 3, 16, 16), jnp.float32, -1.2, 1.2).astype(jnp.bfloat16)
    out5 = jax.block_until_ready(faceswap_forward(img5))
    assert out5.dtype == jnp.bfloat16
    assert float(jnp.max(jnp.abs(out5.astype(jnp.float32) - ref_roundtrip(img5)))) < 0.02

    print("KERNEL_OK")
</pallas_src>

<mosaic_0001>
module attributes {stable_mosaic.version = 11 : i64} {
  func.func @_faceswap_quant_kernel(%arg0: i32, %arg1: memref<3x512xf32, #tpu.memory_space<vmem>>, %arg2: memref<3x512xf32, #tpu.memory_space<vmem>>) attributes {dimension_semantics = [#tpu.dimension_semantics<parallel>], iteration_bounds = array<i64: 1>, scalar_prefetch = 0 : i64, scratch_operands = 0 : i64, tpu.core_type = #tpu.core_type<tc>, window_params = [{transform_indices = @transform_0, window_bounds = array<i64: 3, 512>}, {transform_indices = @transform_1, window_bounds = array<i64: 3, 512>}]} {
    %c0 = arith.constant 0 : index
    %c0_0 = arith.constant 0 : index
    %0 = vector.load %arg1[%c0, %c0_0] : memref<3x512xf32, #tpu.memory_space<vmem>>, vector<3x512xf32>
    %cst = arith.constant -1.000000e+00 : f32
    %cst_1 = arith.constant 1.000000e+00 : f32
    %1 = vector.broadcast %cst : f32 to vector<3x512xf32>
    %2 = arith.maximumf %1, %0 : vector<3x512xf32>
    %3 = vector.broadcast %cst_1 : f32 to vector<3x512xf32>
    %4 = arith.minimumf %3, %2 : vector<3x512xf32>
    %cst_2 = arith.constant 1.000000e+00 : f32
    %5 = vector.broadcast %cst_2 : f32 to vector<3x512xf32>
    %6 = arith.addf %4, %5 : vector<3x512xf32>
    %cst_3 = arith.constant 5.000000e-01 : f32
    %7 = vector.broadcast %cst_3 : f32 to vector<3x512xf32>
    %8 = arith.mulf %6, %7 : vector<3x512xf32>
    %cst_4 = arith.constant 2.550000e+02 : f32
    %9 = vector.broadcast %cst_4 : f32 to vector<3x512xf32>
    %10 = arith.mulf %8, %9 : vector<3x512xf32>
    %cst_5 = arith.constant 5.000000e-01 : f32
    %11 = vector.broadcast %cst_5 : f32 to vector<3x512xf32>
    %12 = arith.addf %10, %11 : vector<3x512xf32>
    %cst_6 = arith.constant 0.000000e+00 : f32
    %cst_7 = arith.constant 2.550000e+02 : f32
    %13 = vector.broadcast %cst_6 : f32 to vector<3x512xf32>
    %14 = arith.maximumf %13, %12 : vector<3x512xf32>
    %15 = vector.broadcast %cst_7 : f32 to vector<3x512xf32>
    %16 = arith.minimumf %15, %14 : vector<3x512xf32>
    %17 = math.floor %16 : vector<3x512xf32>
    %cst_8 = arith.constant 2.550000e+02 : f32
    %18 = vector.broadcast %cst_8 : f32 to vector<3x512xf32>
    %19 = arith.divf %17, %18 : vector<3x512xf32>
    %cst_9 = arith.constant 5.000000e-01 : f32
    %20 = vector.broadcast %cst_9 : f32 to vector<3x512xf32>
    %21 = arith.subf %19, %20 : vector<3x512xf32>
    %cst_10 = arith.constant 5.000000e-01 : f32
    %22 = vector.broadcast %cst_10 : f32 to vector<3x512xf32>
    %23 = arith.divf %21, %22 : vector<3x512xf32>
    %c0_11 = arith.constant 0 : index
    %c0_12 = arith.constant 0 : index
    %24 = vector.load %arg2[%c0_11, %c0_12] : memref<3x512xf32, #tpu.memory_space<vmem>>, vector<3x512xf32>
    tpu.vector_store %arg2[%c0_11, %c0_12], %23 {strides = array<i32>} : memref<3x512xf32, #tpu.memory_space<vmem>>, vector<3x512xf32>,
    return
  }
  func.func @transform_0(%arg0: i32) -> (i32, i32) {
    %c0_i32 = arith.constant 0 : i32
    %c0_i32_0 = arith.constant 0 : i32
    return %arg0, %c0_i32 : i32, i32
  }
  func.func @transform_1(%arg0: i32) -> (i32, i32) {
    %c0_i32 = arith.constant 0 : i32
    %c0_i32_0 = arith.constant 0 : i32
    return %arg0, %c0_i32 : i32, i32
  }
}

</mosaic_0001>

<bundles_post_ra>
// kernel: tpu_custom_call.1
= control target key start
LH: loop header
LB: loop body
LE: loop exit
PB: predicated region body
PF: predicated region fallthrough
CT: control target
= control target key end

     0   :  { %6 = vsyncpa [#allocation3], 0  ;;  %s134_s0 = inlined_call_operand.hbm [shape: f32[3,512], index: 0, kind: input, shape index: {}]   ;;  %s135_s1 = inlined_call_operand.hbm [shape: f32[3,512], index: 1, kind: output, shape index: {}]  }
   0x1   :  { %7 = vsyncpa [#allocation4], 0  ;;  %s116_s6 = smov [#allocation2]  }
   0x2   :  { %s14_s7 = sshll.u32 %s116_s6, 4  ;;  %s15_s7 = int_to_ptr.vmem [resolvable:$true] %s14_s7 }
   0x3   :  { %s80_s8 = scalar_lea.vmem %s15_s7, 256  ;;  %p85_p1 = scmp.lt.s32.totalorder %s15_s7, %s15_s7 }
   0x4   :  { %p81_p0 = scmp.ne.s32.totalorder %s15_s7, %s80_s8  ;;  %p86_p2 = scmp.lt.s32.totalorder %s80_s8, %s80_s8 }
   0x6   :  { %p87_p3 = por %p86_p2, %p85_p1 }
   0x8   :  { %p88_p4 = pnand %p87_p3, %p81_p0 }
   0xa   :  { %91 = shalt.err (!%p88_p4)
}
   0xb   :  { %17 = dma.hbm_to_vmem [thread:$0]  %s134_s0, 256, %s15_s7, [#allocation3]  }
   0xc   :  { %112 = dma.done.wait [#allocation3], 256  }
   0xd   :  { %113 = vsyncadd [#allocation3], 4294967040  ;;  %v21_v0 = vld [vmem:[#allocation2] sm:$0x77]  ;;  %v22_v1 = vld [vmem:[#allocation2 + $0x8] sm:$0x77] }
   0xe   :  { %v66_v2 = vclamps-f32 %v21_v0, 1.0  ;;  %v67_v3 = vclamps-f32 %v22_v1, 1.0  ;;  %s117_s0 = smov [#allocation5]  }
   0xf   :  { %s57_s11 = sshll.u32 %s117_s0, 4  ;;  %s58_s11 = int_to_ptr.vmem [resolvable:$true] %s57_s11 }
  0x10   :  { %v27_v4 = vadd.f32 1.0, %v66_v2  ;;  %v28_v5 = vadd.f32 1.0, %v67_v3  ;;  %s92_s12 = scalar_lea.vmem %s58_s11, 256  ;;  %p97_p6 = scmp.lt.s32.totalorder %s58_s11, %s58_s11 }
  0x11   :  { %p93_p5 = scmp.ne.s32.totalorder %s58_s11, %s92_s12  ;;  %p98_p7 = scmp.lt.s32.totalorder %s92_s12, %s92_s12 }
  0x12   :  { %v29_v6 = vmul.f32 0.5, %v27_v4  ;;  %v30_v7 = vmul.f32 0.5, %v28_v5 }
  0x13   :  { %p99_p8 = por %p98_p7, %p97_p6 }
  0x14   :  { %v31_v8 = vmul.f32 255.0, %v29_v6  ;;  %v32_v9 = vmul.f32 255.0, %v30_v7 }
  0x15   :  { %p100_p9 = pnand %p99_p8, %p93_p5 }
  0x16   :  { %v33_v10 = vadd.f32 0.5, %v31_v8  ;;  %v34_v11 = vadd.f32 0.5, %v32_v9 }
  0x18   :  { %v35_v12 = vmax.f32 %v33_v10, 0.0  ;;  %v36_v13 = vmax.f32 %v34_v11, 0.0 }
  0x1a   :  { %v37_v14 = vmin.f32 %v35_v12, 255.0  ;;  %v38_v15 = vmin.f32 %v36_v13, 255.0 }
  0x1c   :  { %v39_v16 = vfloor.f32 %v37_v14  ;;  %v40_v17 = vfloor.f32 %v38_v15 }
  0x1e   :  { %v42_v18 = vmul.f32 0.003921569, %v39_v16  ;;  %v43_v19 = vmul.f32 0.003921569, %v40_v17 }
  0x20   :  { %v68_v20 = vadd.f32 -0.5, %v42_v18  ;;  %v69_v21 = vadd.f32 -0.5, %v43_v19 }
  0x22   :  { %v47_v22 = vmul.f32 2.0, %v68_v20  ;;  %v48_v23 = vmul.f32 2.0, %v69_v21 }
  0x24   :  { %49 = vst [vmem:[#allocation5] sm:$0x77] %v47_v22  ;;  %50 = vst [vmem:[#allocation5 + $0x8] sm:$0x77] %v48_v23 }
  0x25   :  { %103 = shalt.err (!%p100_p9)
}
  0x26   :  { %60 = dma.vmem_to_hbm [thread:$0]  %s58_s11, 256, %s135_s1, [#allocation4]  }
  0x27   :  { %114 = dma.done.wait [#allocation4], 256  }
  0x28   :  { %115 = vsyncadd [#allocation4], 4294967040 }
  0x29   :  { %64 = vsyncpa [#allocation3], 1 }
  0x2a   :  { %65 = vsyncpa [#allocation4], 1 }

</bundles_post_ra>
